<compile_context>
chip_gen: v6e
topology: v6e:2x2x1
jax: 0.10.0
libtpu: 0.0.40
codegen_flags: <defaults>
</compile_context>

<pallas_src>
import functools

import jax
import jax.numpy as jnp
from jax import lax
from jax.experimental import pallas as pl
from jax.experimental.pallas import tpu as pltpu


# ----------------------------------------------------------------------------
# small helpers
# ----------------------------------------------------------------------------
def _round_up(x, m):
    return (x + m - 1) // m * m


def _pad2(a, rows, cols):
    r, c = a.shape
    if r == rows and c == cols:
        return a
    return jnp.pad(a, ((0, rows - r), (0, cols - c)))


def _pick_tm(batch):
    # bf16 packs two rows per sublane -> keep sublane dims multiples of 16.
    # Large batches: big M tile lifts arithmetic intensity of the
    # weight-streaming linears, but keep >=2 M blocks so both v7x TensorCores
    # get work on the "parallel" grid axis.
    if batch <= 128:
        return _round_up(batch, 16)
    target = 512 if batch >= 512 else 256
    half = _round_up((batch + 1) // 2, 128)        # ceil(B/2) rounded to 128
    return max(128, min(target, half))


def _vmem_limit_bytes():
    # ~3/4 of physical VMEM: ~96 MiB on 128 MiB parts (v5e/v6e), 48 MiB on v7x.
    try:
        info = pltpu.get_tpu_info()
        cap = getattr(info, "vmem_capacity_bytes", None)
        if cap is None:
            cap = getattr(info, "vmem_size_bytes", None)
        if cap:
            return max(32 * 1024 * 1024, min(int(cap) * 3 // 4, 112 * 1024 * 1024))
    except Exception:
        pass
    return 48 * 1024 * 1024                        # safe on every generation


_VMEM_LIMIT = _vmem_limit_bytes()


# ----------------------------------------------------------------------------
# Kernel 1: tiled linear (+ optional fused L2-normalize, F.normalize eps=1e-12)
#   grid = (M tiles, K tiles); N (=Dout, padded to 128) kept whole in the block.
#   f32 accumulator in VMEM scratch, init/finalize via pl.when on the K axis.
#   Activation tiles arrive f32 and are cast to bf16 in VMEM (no pre-cast pass).
# ----------------------------------------------------------------------------
def _linear_kernel(x_ref, w_ref, b_ref, o_ref, acc_ref, *, normalize):
    k = pl.program_id(1)

    @pl.when(k == 0)
    def _():
        acc_ref[...] = jnp.zeros_like(acc_ref)

    acc_ref[...] += jnp.dot(x_ref[...].astype(jnp.bfloat16), w_ref[...],
                            preferred_element_type=jnp.float32)

    @pl.when(k == pl.num_programs(1) - 1)
    def _():
        y = acc_ref[...] + b_ref[...]
        if normalize:
            # F.normalize: y / max(||y||, 1e-12)  ==  y * rsqrt(max(||y||^2, 1e-24))
            ssq = jnp.sum(y * y, axis=-1, keepdims=True)
            y = y * lax.rsqrt(jnp.maximum(ssq, 1e-24))
        o_ref[...] = y.astype(o_ref.dtype)


def linear_pallas(x, w, b, *, normalize=False, tk_max=512, out_dtype=jnp.bfloat16):
    B, Din = x.shape
    Dout = w.shape[1]
    Dout_p = _round_up(Dout, 128)          # lane-dense output stores
    tm = _pick_tm(B)
    M_p = _round_up(B, tm)
    tk = min(tk_max, _round_up(Din, 128))
    K_p = _round_up(Din, tk)
    nk = K_p // tk

    xb = _pad2(x.astype(jnp.float32), M_p, K_p)              # stays f32 in HBM
    wb = _pad2(w, K_p, Dout_p).astype(jnp.bfloat16)
    bb = _pad2(b.reshape(1, Dout), 1, Dout_p).astype(jnp.float32)

    out = pl.pallas_call(
        functools.partial(_linear_kernel, normalize=normalize),
        out_shape=jax.ShapeDtypeStruct((M_p, Dout_p), out_dtype),
        grid=(M_p // tm, nk),
        in_specs=[
            pl.BlockSpec((tm, tk), lambda i, k: (i, k)),
            pl.BlockSpec((tk, Dout_p), lambda i, k: (k, 0)),
            pl.BlockSpec((1, Dout_p), lambda i, k: (0, 0)),
        ],
        out_specs=pl.BlockSpec((tm, Dout_p), lambda i, k: (i, 0)),
        scratch_shapes=[pltpu.VMEM((tm, Dout_p), jnp.float32)],
        compiler_params=pltpu.CompilerParams(
            dimension_semantics=("parallel", "arbitrary"),
            vmem_limit_bytes=_VMEM_LIMIT),
    )(xb, wb, bb)
    return out[:B, :Dout]


# ----------------------------------------------------------------------------
# Kernel 2: fused visual path — encoder linear -> vision_proj -> F.normalize.
#   The encoder activation stays in a VMEM f32 accumulator; only the final
#   normalized embedding (bf16) is written to HBM.
# ----------------------------------------------------------------------------
def _visual_fused_kernel(x_ref, we_ref, be_ref, wp_ref, bp_ref, o_ref, acc_ref):
    k = pl.program_id(1)

    @pl.when(k == 0)
    def _():
        acc_ref[...] = jnp.zeros_like(acc_ref)

    acc_ref[...] += jnp.dot(x_ref[...].astype(jnp.bfloat16), we_ref[...],
                            preferred_element_type=jnp.float32)

    @pl.when(k == pl.num_programs(1) - 1)
    def _():
        h = acc_ref[...] + be_ref[...]                                 # (tm, Dv)
        y = jnp.dot(h.astype(jnp.bfloat16), wp_ref[...],
                    preferred_element_type=jnp.float32) + bp_ref[...]  # (tm, De)
        ssq = jnp.sum(y * y, axis=-1, keepdims=True)
        y = y * lax.rsqrt(jnp.maximum(ssq, 1e-24))                     # F.normalize
        o_ref[...] = y.astype(o_ref.dtype)


def visual_encode_project_pallas(x_img, w_enc, b_enc, w_vproj, b_vproj,
                                 *, tk_max=512, out_dtype=jnp.bfloat16):
    B, Din = x_img.shape
    Dv = w_enc.shape[1]
    De = w_vproj.shape[1]
    Dv_p = _round_up(Dv, 128)
    De_p = _round_up(De, 128)
    tm = _pick_tm(B)
    M_p = _round_up(B, tm)
    tk = min(tk_max, _round_up(Din, 128))
    K_p = _round_up(Din, tk)
    nk = K_p // tk

    xb = _pad2(x_img.astype(jnp.float32), M_p, K_p)          # stays f32 in HBM
    web = _pad2(w_enc, K_p, Dv_p).astype(jnp.bfloat16)
    beb = _pad2(b_enc.reshape(1, Dv), 1, Dv_p).astype(jnp.float32)
    wpb = _pad2(w_vproj, Dv_p, De_p).astype(jnp.bfloat16)
    bpb = _pad2(b_vproj.reshape(1, De), 1, De_p).astype(jnp.float32)

    out = pl.pallas_call(
        _visual_fused_kernel,
        out_shape=jax.ShapeDtypeStruct((M_p, De_p), out_dtype),
        grid=(M_p // tm, nk),
        in_specs=[
            pl.BlockSpec((tm, tk), lambda i, k: (i, k)),
            pl.BlockSpec((tk, Dv_p), lambda i, k: (k, 0)),
            pl.BlockSpec((1, Dv_p), lambda i, k: (0, 0)),
            pl.BlockSpec((Dv_p, De_p), lambda i, k: (0, 0)),
            pl.BlockSpec((1, De_p), lambda i, k: (0, 0)),
        ],
        out_specs=pl.BlockSpec((tm, De_p), lambda i, k: (i, 0)),
        scratch_shapes=[pltpu.VMEM((tm, Dv_p), jnp.float32)],
        compiler_params=pltpu.CompilerParams(
            dimension_semantics=("parallel", "arbitrary"),
            vmem_limit_bytes=_VMEM_LIMIT),
    )(xb, web, beb, wpb, bpb)
    return out[:B, :De]


# ----------------------------------------------------------------------------
# Kernel 3: CLIP contrastive loss (ita_type='clip', personalized_tau=False)
#   logits = image_feat @ text_feat.T / temp
#   loss   = 0.5 * (CE(logits, arange) + CE(logits.T, arange))
# Flash-style: grid over text blocks ("arbitrary"); running (m, l) accumulators
# for the image->text logsumexp; exact per-block logsumexp over the resident
# image axis for text->image.  Only ONE exp over the (B, tn) block per step;
# all other exps are (B, 1) vectors.  The positive-pair diagonal term is
# computed once in glue (the MXU already produced those values here).
# ----------------------------------------------------------------------------
def _clip_loss_kernel(img_ref, txt_ref, out_ref, m_row, l_row, acc,
                      *, inv_temp, n_valid, tn, padded):
    j = pl.program_id(0)
    nj = pl.num_programs(0)

    @pl.when(j == 0)
    def _():
        m_row[...] = jnp.full_like(m_row, -jnp.inf)
        l_row[...] = jnp.zeros_like(l_row)
        acc[...] = jnp.zeros_like(acc)

    img = img_ref[...]                                  # (Bp, E) bf16, resident
    txt = txt_ref[...]                                  # (tn, E) bf16

    # scaled logits block, f32 MXU accumulation; 1/temp applied to the f32
    # result (no extra bf16 rounding, single f32 VPU pass on v5e).
    s = lax.dot_general(img, txt, (((1,), (1,)), ((), ())),
                        preferred_element_type=jnp.float32) * inv_temp   # (Bp, tn)

    if padded:
        bp = s.shape[0]
        row_ok = lax.broadcasted_iota(jnp.int32, (bp, 1), 0) < n_valid   # (Bp,1)
        col_ok = (lax.broadcasted_iota(jnp.int32, (1, tn), 1) + j * tn) < n_valid
        s = jnp.where(row_ok & col_ok, s, -jnp.inf)
        r_max = jnp.maximum(jnp.max(s, axis=1, keepdims=True), -1e30)    # (Bp,1)
    else:
        r_max = jnp.max(s, axis=1, keepdims=True)                        # (Bp,1)

    # the single big exp over the (Bp, tn) block (EUP is the binding unit)
    p = jnp.exp(s - r_max)                                               # (Bp, tn)

    # text->image: exact logsumexp over the resident image axis, rescaled to
    # the block max; only a (Bp,1) exp on top of p.
    blk_max = jnp.max(r_max, axis=0, keepdims=True)                      # (1,1)
    col_sum = jnp.sum(p * jnp.exp(r_max - blk_max), axis=0, keepdims=True)
    lse_col = jnp.log(col_sum) + blk_max                                 # (1, tn)
    if padded:
        lse_col = jnp.where(col_ok, lse_col, 0.0)
    acc[...] += jnp.sum(lse_col, axis=1, keepdims=True)

    # image->text: online (flash-style) logsumexp across text blocks; the
    # rescale factors are (Bp,1) exps only.
    m_prev = m_row[...]
    m_new = jnp.maximum(m_prev, r_max)
    l_row[...] = (l_row[...] * jnp.exp(m_prev - m_new)
                  + jnp.sum(p, axis=1, keepdims=True) * jnp.exp(r_max - m_new))
    m_row[...] = m_new

    @pl.when(j == nj - 1)
    def _():
        lse_row = m_row[...] + jnp.log(l_row[...])                       # (Bp,1)
        if padded:
            rr = lax.broadcasted_iota(jnp.int32, lse_row.shape, 0) < n_valid
            lse_row = jnp.where(rr, lse_row, 0.0)
        out_ref[...] = acc[...] + jnp.sum(lse_row, axis=0, keepdims=True)


def clip_loss_pallas(image_feat, text_feat, temperature):
    B, E = image_feat.shape
    E_p = _round_up(E, 128)
    inv_temp = float(1.0 / temperature)

    # bf16-friendly tiling: text-block size is a multiple of 16 (prefer large
    # blocks); pad the batch with masked rows/cols instead of shrinking tn.
    B_pad = _round_up(B, 16)
    tn = 16
    for cand in (256, 128, 64, 32, 16):
        if B_pad % cand == 0:
            tn = cand
            break
    padded = (B_pad != B)

    img = _pad2(image_feat, B_pad, E_p).astype(jnp.bfloat16)
    txt = _pad2(text_feat, B_pad, E_p).astype(jnp.bfloat16)
    n_blk = B_pad // tn

    kernel = functools.partial(_clip_loss_kernel, inv_temp=inv_temp,
                               n_valid=B, tn=tn, padded=padded)
    sums = pl.pallas_call(
        kernel,
        out_shape=jax.ShapeDtypeStruct((1, 1), jnp.float32),
        grid=(n_blk,),
        in_specs=[
            pl.BlockSpec((B_pad, E_p), lambda j: (0, 0)),    # image feats resident
            pl.BlockSpec((tn, E_p), lambda j: (j, 0)),       # text block per step
        ],
        out_specs=pl.BlockSpec((1, 1), lambda j: (0, 0)),
        scratch_shapes=[
            pltpu.VMEM((B_pad, 1), jnp.float32),   # running row max
            pltpu.VMEM((B_pad, 1), jnp.float32),   # running row sum-exp
            pltpu.VMEM((1, 1), jnp.float32),       # t2i lse accumulator
        ],
        compiler_params=pltpu.CompilerParams(
            dimension_semantics=("arbitrary",),
            vmem_limit_bytes=_VMEM_LIMIT),
    )(img, txt)

    # positive-pair (diagonal) term: one cheap fused elementwise reduce in glue
    # (avoids a per-block recompute inside the kernel).
    diag_sum = inv_temp * jnp.sum(image_feat.astype(jnp.float32)
                                  * text_feat.astype(jnp.float32))
    return 0.5 * (sums[0, 0] - 2.0 * diag_sum) / B


# ----------------------------------------------------------------------------
# CLIP.forward equivalent
# ----------------------------------------------------------------------------
def clip_forward(image, text_ids, params, temperature=0.01):
    """Returns (loss_ita, {'image_features': ..., 'text_features': ...})."""
    B = image.shape[0]

    # --- visual path: encoder stand-in + vision_proj + F.normalize (fused) ---
    x_img = image.reshape(B, -1)                           # glue: NCHW -> (B, C*H*W)
    image_feat = visual_encode_project_pallas(
        x_img, params["w_enc"], params["b_enc"],
        params["w_vproj"], params["b_vproj"])              # (B, embed_dim), unit norm, bf16

    # --- text path ----------------------------------------------------------
    # TODO(synk): stand-in for self.text_encoder (HF transformer); embedding lookup
    hidden = jnp.take(params["emb_table"], text_ids, axis=0)   # (B, seq, txt_dim)
    cls = hidden[:, 0, :]                                       # last_hidden_state[:, 0, :]
    text_feat = linear_pallas(cls, params["w_tproj"], params["b_tproj"],
                              normalize=True)              # (B, embed_dim), unit norm, bf16

    # --- CLIP loss (ita_type='clip', non-personalized temperature) -----------
    loss_ita = clip_loss_pallas(image_feat, text_feat, temperature)

    return loss_ita, {"image_features": image_feat, "text_features": text_feat}


# ----------------------------------------------------------------------------
if __name__ == "__main__":
    key = jax.random.PRNGKey(0)
    ks = jax.random.split(key, 8)

    # small shapes consistent with the module's forward
    B, C, H, W = 8, 4, 16, 16        # image: NCHW
    seq, vocab = 8, 64               # text tokens
    vis_dim, txt_dim = 32, 32        # encoder output widths (stand-ins)
    embed_dim = 128                  # CLIP joint embedding dim
    temp = 0.01                      # default temp (learnable_temp=False)

    image = jax.random.normal(ks[0], (B, C, H, W), dtype=jnp.float32)
    text_ids = jax.random.randint(ks[1], (B, seq), 0, vocab, dtype=jnp.int32)

    scale = 0.02
    params = {
        # synthetic visual encoder (stand-in for timm backbone)
        "w_enc":   scale * jax.random.normal(ks[2], (C * H * W, vis_dim), jnp.float32),
        "b_enc":   jnp.zeros((vis_dim,), jnp.float32),
        # synthetic text encoder embedding table (stand-in for HF transformer)
        "emb_table": scale * jax.random.normal(ks[3], (vocab, txt_dim), jnp.float32),
        # vision_proj: Linear(num_features, embed_dim)
        "w_vproj": scale * jax.random.normal(ks[4], (vis_dim, embed_dim), jnp.float32),
        "b_vproj": jnp.zeros((embed_dim,), jnp.float32),
        # text_proj: Linear(txt_hidden, embed_dim)
        "w_tproj": scale * jax.random.normal(ks[5], (txt_dim, embed_dim), jnp.float32),
        "b_tproj": jnp.zeros((embed_dim,), jnp.float32),
    }

    loss, info = clip_forward(image, text_ids, params, temperature=temp)
    loss = jax.block_until_ready(loss)
    img_f = jax.block_until_ready(info["image_features"])
    txt_f = jax.block_until_ready(info["text_features"])

    # sanity: shapes, unit-normalized features, finite scalar loss
    assert img_f.shape == (B, embed_dim)
    assert txt_f.shape == (B, embed_dim)
    img_norms = jnp.linalg.norm(img_f.astype(jnp.float32), axis=-1)
    txt_norms = jnp.linalg.norm(txt_f.astype(jnp.float32), axis=-1)
    assert bool(jnp.all(jnp.abs(img_norms - 1.0) < 1e-2))
    assert bool(jnp.all(jnp.abs(txt_norms - 1.0) < 1e-2))
    assert bool(jnp.isfinite(loss))
    print("KERNEL_OK")
</pallas_src>

<mosaic_0001>
module attributes {stable_mosaic.version = 11 : i64} {
  func.func @_visual_fused_kernel(%arg0: i32, %arg1: i32, %arg2: memref<16x512xf32, #tpu.memory_space<vmem>>, %arg3: memref<512x128xbf16, #tpu.memory_space<vmem>>, %arg4: memref<1x128xf32, #tpu.memory_space<vmem>>, %arg5: memref<128x128xbf16, #tpu.memory_space<vmem>>, %arg6: memref<1x128xf32, #tpu.memory_space<vmem>>, %arg7: memref<16x128xbf16, #tpu.memory_space<vmem>>, %arg8: memref<16x128xf32, #tpu.memory_space<vmem>>) attributes {dimension_semantics = [#tpu.dimension_semantics<parallel>, #tpu.dimension_semantics<arbitrary>], iteration_bounds = array<i64: 1, 2>, scalar_prefetch = 0 : i64, scratch_operands = 1 : i64, tpu.core_type = #tpu.core_type<tc>, window_params = [{transform_indices = @transform_0, window_bounds = array<i64: 16, 512>}, {transform_indices = @transform_1, window_bounds = array<i64: 512, 128>}, {pipeline_mode = #tpu.pipeline_mode<synchronous>, transform_indices = @transform_2, window_bounds = array<i64: 1, 128>}, {pipeline_mode = #tpu.pipeline_mode<synchronous>, transform_indices = @transform_3, window_bounds = array<i64: 128, 128>}, {pipeline_mode = #tpu.pipeline_mode<synchronous>, transform_indices = @transform_4, window_bounds = array<i64: 1, 128>}, {transform_indices = @transform_5, window_bounds = array<i64: 16, 128>}]} {
    %c0_i32 = arith.constant 0 : i32
    %0 = arith.cmpi eq, %arg1, %c0_i32 : i32
    %1 = arith.extui %0 : i1 to i32
    %c0_i32_0 = arith.constant 0 : i32
    %2 = arith.cmpi ne, %1, %c0_i32_0 : i32
    scf.if %2 {
      %cst_9 = arith.constant 0.000000e+00 : f32
      %13 = vector.broadcast %cst_9 : f32 to vector<16x128xf32>
      %c0_10 = arith.constant 0 : index
      %c0_11 = arith.constant 0 : index
      %14 = vector.load %arg8[%c0_10, %c0_11] : memref<16x128xf32, #tpu.memory_space<vmem>>, vector<16x128xf32>
      tpu.vector_store %arg8[%c0_10, %c0_11], %13 {strides = array<i32>} : memref<16x128xf32, #tpu.memory_space<vmem>>, vector<16x128xf32>,
    } else {
    }
    %c0 = arith.constant 0 : index
    %c0_1 = arith.constant 0 : index
    %3 = vector.load %arg8[%c0, %c0_1] : memref<16x128xf32, #tpu.memory_space<vmem>>, vector<16x128xf32>
    %c0_2 = arith.constant 0 : index
    %c0_3 = arith.constant 0 : index
    %4 = vector.load %arg2[%c0_2, %c0_3] : memref<16x512xf32, #tpu.memory_space<vmem>>, vector<16x512xf32>
    %5 = arith.truncf %4 : vector<16x512xf32> to vector<16x512xbf16>
    %c0_4 = arith.constant 0 : index
    %c0_5 = arith.constant 0 : index
    %6 = vector.load %arg3[%c0_4, %c0_5] : memref<512x128xbf16, #tpu.memory_space<vmem>>, vector<512x128xbf16>
    %cst = arith.constant dense<0.000000e+00> : vector<16x128xf32>
    %7 = tpu.matmul %5, %6, %cst {dimension_numbers = #tpu.dot_dimension_numbers<[1], [0], [0], [1], [0, 0, 1, 1], [], []>} : vector<16x512xbf16>, vector<512x128xbf16>, vector<16x128xf32> -> vector<16x128xf32>
    %8 = arith.addf %3, %7 : vector<16x128xf32>
    %c0_6 = arith.constant 0 : index
    %c0_7 = arith.constant 0 : index
    %9 = vector.load %arg8[%c0_6, %c0_7] : memref<16x128xf32, #tpu.memory_space<vmem>>, vector<16x128xf32>
    tpu.vector_store %arg8[%c0_6, %c0_7], %8 {strides = array<i32>} : memref<16x128xf32, #tpu.memory_space<vmem>>, vector<16x128xf32>,
    %c1_i32 = arith.constant 1 : i32
    %10 = arith.cmpi eq, %arg1, %c1_i32 : i32
    %11 = arith.extui %10 : i1 to i32
    %c0_i32_8 = arith.constant 0 : i32
    %12 = arith.cmpi ne, %11, %c0_i32_8 : i32
    scf.if %12 {
      %c0_9 = arith.constant 0 : index
      %c0_10 = arith.constant 0 : index
      %13 = vector.load %arg8[%c0_9, %c0_10] : memref<16x128xf32, #tpu.memory_space<vmem>>, vector<16x128xf32>
      %c0_11 = arith.constant 0 : index
      %c0_12 = arith.constant 0 : index
      %14 = vector.load %arg4[%c0_11, %c0_12] : memref<1x128xf32, #tpu.memory_space<vmem>>, vector<1x128xf32>
      %15 = vector.broadcast %14 : vector<1x128xf32> to vector<16x128xf32>
      %16 = arith.addf %13, %15 : vector<16x128xf32>
      %17 = arith.truncf %16 : vector<16x128xf32> to vector<16x128xbf16>
      %c0_13 = arith.constant 0 : index
      %c0_14 = arith.constant 0 : index
      %18 = vector.load %arg5[%c0_13, %c0_14] : memref<128x128xbf16, #tpu.memory_space<vmem>>, vector<128x128xbf16>
      %cst_15 = arith.constant dense<0.000000e+00> : vector<16x128xf32>
      %19 = tpu.matmul %17, %18, %cst_15 {dimension_numbers = #tpu.dot_dimension_numbers<[1], [0], [0], [1], [0, 0, 1, 1], [], []>} : vector<16x128xbf16>, vector<128x128xbf16>, vector<16x128xf32> -> vector<16x128xf32>
      %c0_16 = arith.constant 0 : index
      %c0_17 = arith.constant 0 : index
      %20 = vector.load %arg6[%c0_16, %c0_17] : memref<1x128xf32, #tpu.memory_space<vmem>>, vector<1x128xf32>
      %21 = vector.broadcast %20 : vector<1x128xf32> to vector<16x128xf32>
      %22 = arith.addf %19, %21 : vector<16x128xf32>
      %23 = arith.mulf %22, %22 : vector<16x128xf32>
      %cst_18 = arith.constant dense<0.000000e+00> : vector<16xf32>
      %24 = vector.multi_reduction <add>, %23, %cst_18 [1] : vector<16x128xf32> to vector<16xf32>
      %25 = vector.shape_cast %24 : vector<16xf32> to vector<16x1xf32>
      %cst_19 = arith.constant 1.000000e-24 : f32
      %26 = vector.broadcast %cst_19 : f32 to vector<16x1xf32>
      %27 = arith.maximumf %25, %26 : vector<16x1xf32>
      %28 = math.rsqrt %27 : vector<16x1xf32>
      %29 = vector.broadcast %28 : vector<16x1xf32> to vector<16x128xf32>
      %30 = arith.mulf %22, %29 : vector<16x128xf32>
      %31 = arith.truncf %30 : vector<16x128xf32> to vector<16x128xbf16>
      %c0_20 = arith.constant 0 : index
      %c0_21 = arith.constant 0 : index
      %32 = vector.load %arg7[%c0_20, %c0_21] : memref<16x128xbf16, #tpu.memory_space<vmem>>, vector<16x128xbf16>
      tpu.vector_store %arg7[%c0_20, %c0_21], %31 {strides = array<i32>} : memref<16x128xbf16, #tpu.memory_space<vmem>>, vector<16x128xbf16>,
    } else {
    }
    return
  }
  func.func @transform_0(%arg0: i32, %arg1: i32) -> (i32, i32) {
    %c0_i32 = arith.constant 0 : i32
    return %arg0, %arg1 : i32, i32
  }
  func.func @transform_1(%arg0: i32, %arg1: i32) -> (i32, i32) {
    %c0_i32 = arith.constant 0 : i32
    %c0_i32_0 = arith.constant 0 : i32
    return %arg1, %c0_i32 : i32, i32
  }
  func.func @transform_2(%arg0: i32, %arg1: i32) -> (i32, i32) {
    %c0_i32 = arith.constant 0 : i32
    %c0_i32_0 = arith.constant 0 : i32
    %c0_i32_1 = arith.constant 0 : i32
    return %c0_i32, %c0_i32_0 : i32, i32
  }
  func.func @transform_3(%arg0: i32, %arg1: i32) -> (i32, i32) {
    %c0_i32 = arith.constant 0 : i32
    %c0_i32_0 = arith.constant 0 : i32
    %c0_i32_1 = arith.constant 0 : i32
    return %c0_i32, %c0_i32_0 : i32, i32
  }
  func.func @transform_4(%arg0: i32, %arg1: i32) -> (i32, i32) {
    %c0_i32 = arith.constant 0 : i32
    %c0_i32_0 = arith.constant 0 : i32
    %c0_i32_1 = arith.constant 0 : i32
    return %c0_i32, %c0_i32_0 : i32, i32
  }
  func.func @transform_5(%arg0: i32, %arg1: i32) -> (i32, i32) {
    %c0_i32 = arith.constant 0 : i32
    %c0_i32_0 = arith.constant 0 : i32
    return %arg0, %c0_i32 : i32, i32
  }
}

</mosaic_0001>

<bundles_post_ra>
// kernel: tpu_custom_call.1
= control target key start
LH: loop header
LB: loop body
LE: loop exit
PB: predicated region body
PF: predicated region fallthrough
CT: control target
= control target key end

     0   :  { %s1634_s0 = inlined_call_operand.hbm [shape: f32[16,1024], index: 0, kind: input, shape index: {}]   ;;  %s1635_s1 = inlined_call_operand.hbm [shape: bf16[1024,128], index: 1, kind: input, shape index: {}]   ;;  %s1636_s2 = inlined_call_operand.vmem [shape: f32[1,128], index: 2, kind: input, shape index: {}]   ;;  %s1637_s3 = inlined_call_operand.hbm [shape: bf16[128,128], index: 3, kind: input, shape index: {}]   ;;  %s1638_s4 = inlined_call_operand.vmem [shape: f32[1,128], index: 4, kind: input, shape index: {}]   ;;  %s1639_s5 = inlined_call_operand.hbm [shape: bf16[16,128], index: 5, kind: output, shape index: {}]  }
   0x1   :  { %1646 = sst [smem:[#allocation17_spill]] %s1634_s0 }
   0x2   :  { %1647 = sst [smem:[#allocation18_spill]] %s1637_s3 }
   0x3   :  { %10 = vsyncpa [#allocation4], 0 }
   0x4   :  { %12 = vsyncpa [#allocation4 + $0x1], 0 }
   0x5   :  { %13 = vsyncpa [#allocation7], 0 }
   0x6   :  { %15 = vsyncpa [#allocation7 + $0x1], 0 }
   0x7   :  { %16 = vsyncpa [#allocation5], 0  ;;  %s1424_s18 = smov 0   ;;  %s1426_s19 = smov 0  }
   0x8   :  { %s1428_s20 = smov 0   ;;  %s1430_s21 = smov 0  }
   0x9   :  { %s1432_s22 = smov 0   ;;  %s1434_s23 = smov 0  }
   0xa LB: > { %1648 = sst [smem:[#allocation14_spill]] %s1366_s20  ;;  %s1453_s24 = sadd.s32 4294967295, %s1378_s23   ;;  %s1378_s23 = sphi %s1434_s23, %s22_s23   ;;  %s1374_s22 = sphi %s1432_s22, %s1667_s22   ;;  %s1370_s21 = sphi %s1430_s21, %s1666_s21   ;;  %s1366_s20 = sphi %s1428_s20, %s1662_s20   ;;  %s1362_s19 = sphi %s1426_s19, %s1665_s19   ;;  %s1358_s18 = sphi %s1424_s18, %s1664_s18  }
   0xb   : > { %s43_s25 = sadd.s32 1, %s1366_s20  ;;  %p50_p0 = scmp.ne.s32.totalorder %s1366_s20, %s1362_s19 }
   0xc   : > { %p51_p1 = scmp.eq.s32.totalorder %s1378_s23, 0  ;;  %p56_p2 = scmp.ne.s32.totalorder %s1362_s19, %s1358_s18 }
   0xd   : > { %p57_p3 = scmp.eq.s32.totalorder %s1453_s24, 0  ;;  %p933_p5 = scmp.ge.s32.totalorder %s1378_s23, 1 }
   0xe   : > { %p52_p4 = por %p51_p1, %p50_p0  ;;  %p182_p7 = scmp.lt.s32.totalorder %s1378_s23, 3 }
   0xf   : > { %p1464_p6 = por %p57_p3, %p56_p2  ;;  %s1380_s28 = smov [#allocation8]  }
  0x10   : > { %p1469_p8 = pnand %p933_p5, %p182_p7  ;;  %s197_s29 = sshll.u32 %s1380_s28, 4  ;;  %s198_s29 = int_to_ptr.vmem [resolvable:$true] %s197_s29 }
  0x11   : > { %s1649_s26 = scalar_select %p1464_p6, 1, 0 }
  0x12   : > { %s1650_s27 = scalar_select %p1469_p8, 1, 0 }
  0x13   : > { %p1090_p9 = pneg %p1469_p8  ;;  %p1102_p10 = scmp.lt.s32.totalorder %s1378_s23, 2 }
  0x14   : > { %s31_s7 = sadd.s32 1, %s1374_s22  ;;  %s1221_s8 = scalar_lea.vmem %s198_s29, 1024 }
  0x15   : > { %p1478_p11 = pnand %p1090_p9, %p57_p3  ;;  %p1482_p12 = pnand %p1102_p10, %p52_p4 }
  0x16   : > { %p1222_p0 = scmp.ne.s32.totalorder %s198_s29, %s1221_s8  ;;  %p1229_p5 = scmp.lt.s32.totalorder %s198_s29, %s198_s29 }
  0x17   : > { %p1212_p13 = pneg %p1478_p11  ;;  %p1230_p7 = scmp.lt.s32.totalorder %s1221_s8, %s1221_s8 }
  0x19   : > { %p1224_p1 = pnand %p1222_p0, %p1212_p13  ;;  %p1231_p6 = por %p1230_p7, %p1229_p5 }
  0x1b   : > { %p1225_p2 = pneg %p1224_p1 }
  0x1d   : > { %p1232_p8 = pnand %p1231_p6, %p1225_p2 }
  0x1f   : > { %1235 = shalt.err (!%p1232_p8)
}
  0x20   : > { %s1642_s9 = smov 64   ;;  %s1643_s10 = smov 4  }
  0x21   : > { %s1653_s3 = sld [smem:[#allocation18_spill]]  ;;  %p32_p4 = scmp.ge.s32.totalorder %s31_s7, 2 }
  0x22   : > { %s1498_s13 = sand.u32 1, %s1366_s20   ;;  %s996_s14 = sshll.u32 %s1374_s22, 9 }
  0x23   : > { %s1669_s7 = smov (%p32_p4, %s31_s7), 0  ;;  %s936_s15 = sshll.u32 %s1498_s13, 6 }
  0x24   : > { %1654 = sst [smem:[#allocation15_spill]] %s1669_s7  ;;  %s39_s16 = ssub.s32 %s1374_s22, %s1669_s7 }
  0x25   : > { %p41_p6 = scmp.eq.s32.totalorder %s39_s16, 0  ;;  %s1655_s0 = sld [smem:[#allocation17_spill]] }
  0x26   : > { %s218_s30 = scalar_lea.vmem [#allocation3], %s936_s15  ;;  %s238_s11 = sand.u32 1, %s1378_s23  }
  0x27   : > { %1093 = dma.hbm_to_vmem [thread:$0]  (!%p1478_p11), %s1653_s3, 1024, %s198_s29, [#allocation7], %s1642_s9, %s1642_s9, %s1643_s10  }
  0x28   : > { %s228_s8 = sshll.u32 %s218_s30, 4  ;;  %s215_s12 = scalar_lea.sflag [#allocation4], %s1498_s13  ;;  %s229_s8 = int_to_ptr.vmem [resolvable:$true] %s228_s8 }
  0x29   : > { %s1512_s29 = scalar_select %p41_p6, %s1366_s20, %s43_s25  }
  0x2a   : > { %p1238_p8 = pneg %p1482_p12  ;;  %s1249_s9 = scalar_lea.vmem %s229_s8, 1024 }
  0x2b   : > { %s227_s28 = scalar_lea.hbm %s1655_s0, %s996_s14  ;;  %1656 = sst [smem:[#allocation16_spill]] %s1512_s29 }
  0x2c   : > { %p1250_p9 = scmp.ne.s32.totalorder %s229_s8, %s1249_s9  ;;  %s1383_s16 = smov [#allocation3]  }
  0x2d   : > { %s1254_s10 = sshll.u32 %s1383_s16, 4  ;;  %s1255_s10 = int_to_ptr.vmem [resolvable:$false] %s1254_s10 }
  0x2e   : > { %p1252_p10 = pnand %p1250_p9, %p1238_p8  ;;  %s1256_s14 = scalar_lea.vmem %s1255_s10, 2048 }
  0x2f   : > { %p1257_p13 = scmp.lt.s32.totalorder %s229_s8, %s1255_s10  ;;  %p1258_p0 = scmp.lt.s32.totalorder %s1256_s14, %s1249_s9 }
  0x30   : > { %p1253_p11 = pneg %p1252_p10 }
  0x31   : > { %p1259_p1 = por %p1258_p0, %p1257_p13 }
  0x33   : > { %p1260_p2 = pnand %p1259_p1, %p1253_p11 }
  0x35   : > { %1263 = shalt.err (!%p1260_p2)
}
  0x36   : > { %s1384_s25 = smov 1024   ;;  %s1385_s15 = smov 512  }
  0x37   : > { %s1386_s17 = smov 32   ;;  %s939_s18 = sshll.u32 %s1498_s13, 8 }
  0x38   : > { %1097 = dma.hbm_to_vmem [thread:$0]  (!%p1482_p12), %s227_s28, 1024, %s229_s8, %s215_s12, %s1384_s25, %s1385_s15, %s1386_s17  }
  0x39   : > { %s997_s30 = sshll.u32 %s1374_s22, 12  ;;  %s242_s10 = scalar_lea.vmem [#allocation6], %s939_s18 }
  0x3a   : > { %s248_s3 = scalar_lea.hbm %s1635_s1, %s997_s30  ;;  %s249_s9 = sshll.u32 %s242_s10, 4  ;;  %s250_s9 = int_to_ptr.vmem [resolvable:$true] %s249_s9 }
  0x3b   : > { %s239_s14 = scalar_lea.sflag [#allocation7], %s238_s11  ;;  %s1277_s7 = scalar_lea.vmem %s250_s9, 4096 }
  0x3c   : > { %p1278_p5 = scmp.ne.s32.totalorder %s250_s9, %s1277_s7  ;;  %s1387_s29 = smov [#allocation6]  }
  0x3d   : > { %s1282_s20 = sshll.u32 %s1387_s29, 4  ;;  %s1283_s20 = int_to_ptr.vmem [resolvable:$false] %s1282_s20 }
  0x3e   : > { %p1280_p7 = pnand %p1278_p5, %p1238_p8  ;;  %s1284_s28 = scalar_lea.vmem %s1283_s20, 8192 }
  0x3f   : > { %p1285_p6 = scmp.lt.s32.totalorder %s250_s9, %s1283_s20  ;;  %p1286_p9 = scmp.lt.s32.totalorder %s1284_s28, %s1277_s7 }
  0x40   : > { %p1281_p4 = pneg %p1280_p7 }
  0x41   : > { %p1287_p10 = por %p1286_p9, %p1285_p6 }
  0x43   : > { %p1288_p11 = pnand %p1287_p10, %p1281_p4 }
  0x45   : > { %1291 = shalt.err (!%p1288_p11)
}
  0x46   : > { %s1657_s0 = smov 4   ;;  %s1658_s13 = smov 64  }
  0x47   : > { %1100 = dma.hbm_to_vmem [thread:$0]  (!%p1482_p12), %s248_s3, 4096, %s250_s9, %s239_s14, %s1658_s13, %s1658_s13, %s1657_s0  }
  0x48   : > { %p1659_p13 = scmp.ne.s32.totalorder %s1650_s27, 0 }
  0x49   : > { %s263_s8 = sand.u32 (!%p1659_p13), 1, %s1362_s19   ;;  %p1660_p8 = scmp.ne.s32.totalorder (!%p1659_p13), %s1649_s26, 0 }
  0x4a   : > { %261 = sbr.rel (%p1659_p13) target bundleno = 744 (0x2e8), region = 40  ;;  %s943_s29 = sshll.u32 (!%p1659_p13), %s263_s8, 6 }
  0x4b   : > { %s264_s11 = scalar_lea.sflag (!%p1659_p13), [#allocation4], %s263_s8  ;;  %s1539_s12 = scalar_lea.vmem (!%p1659_p13), [#allocation3], %s943_s29 }
  0x4f   : > { %1341 = dma.done.wait (%p1660_p8), %s264_s11, 1024  }
  0x50   : > { %1343 = vsyncadd (%p1660_p8), %s264_s11, 4294966272  ;;  %s272_s20 = sand.u32 1, %s1453_s24   ;;  %s944_s6 = sshll.u32 %s263_s8, 8 }
  0x51   : > { %s273_s3 = scalar_lea.sflag [#allocation7], %s272_s20  ;;  %s1546_s7 = scalar_lea.vmem [#allocation6], %s944_s6 }
  0x52   : > { %1345 = dma.done.wait (%p1660_p8), %s273_s3, 4096  }
  0x53   : > { %1347 = vsyncadd (%p1660_p8), %s273_s3, 4294963200 }
  0x54   : > { %1349 = dma.done.wait (%p57_p3), [#allocation7], 1024  }
  0x55   : > { %1351 = vsyncadd (%p57_p3), [#allocation7], 4294966272  ;;  %p946_p12 = scmp.ne.s32.totalorder %s1370_s21, 0 }
  0x57   : > { %315 = sbr.rel (%p946_p12) target bundleno = 94 (0x5e), region = 56 }
  0x5c   : > { %v1388_v0 = vmov 0.0  }
  0x5d   : > { %316 = vst [vmem:[#allocation2] sm:$0xff] %v1388_v0  ;;  %317 = vst [vmem:[#allocation2 + $0x8] sm:$0xff] %v1388_v0 }
  0x5e PF: > { %v1166_v1 = vld [vmem:[%s1546_s7 + $0x78] sm:$0xff]   ;;  %v1170_v5 = vld [vmem:[%s1546_s7 + $0x70] sm:$0xff]   ;;  %v1174_v9 = vld [vmem:[%s1546_s7 + $0x68] sm:$0xff]   ;;  %p979_p3 = scmp.ne.s32.totalorder %s1370_s21, 1 }
  0x5f   : > { %v1167_v2 = vld [vmem:[%s1546_s7 + $0xf8] sm:$0xff]   ;;  %1005 = vmatprep.subr.bf16.mxu0 %v1166_v1  ;;  %v1171_v6 = vld [vmem:[%s1546_s7 + $0xf0] sm:$0xff]   ;;  %v1175_v10 = vld [vmem:[%s1546_s7 + $0xe8] sm:$0xff]  }
  0x60   : > { %v1168_v3 = vld [vmem:[%s1546_s7 + $0x38] sm:$0xff]   ;;  %1027 = vmatprep.subr.bf16.mxu1 %v1167_v2  ;;  %v1172_v7 = vld [vmem:[%s1546_s7 + $0x30] sm:$0xff]   ;;  %v1176_v11 = vld [vmem:[%s1546_s7 + $0x28] sm:$0xff]  }
  0x61   : > { %v1169_v4 = vld [vmem:[%s1546_s7 + $0xb8] sm:$0xff]   ;;  %1006 = vmatpush3.bf16.msra.mxu0 %v1168_v3  ;;  %v1173_v8 = vld [vmem:[%s1546_s7 + $0xb0] sm:$0xff]   ;;  %v1177_v12 = vld [vmem:[%s1546_s7 + $0xa8] sm:$0xff]  }
  0x62   : > { %1028 = vmatpush3.bf16.msra.mxu1 %v1169_v4  ;;  %1007 = vmatprep.subr.bf16.mxu0 %v1170_v5  ;;  %v1178_v13 = vld [vmem:[%s1546_s7 + $0x60] sm:$0xff]   ;;  %v1182_v17 = vld [vmem:[%s1546_s7 + $0x58] sm:$0xff]   ;;  %v1186_v21 = vld [vmem:[%s1546_s7 + $0x50] sm:$0xff]  }
  0x63   : > { %1029 = vmatprep.subr.bf16.mxu1 %v1171_v6  ;;  %v1179_v14 = vld [vmem:[%s1546_s7 + $0xe0] sm:$0xff]   ;;  %v1183_v18 = vld [vmem:[%s1546_s7 + $0xd8] sm:$0xff]   ;;  %v1187_v22 = vld [vmem:[%s1546_s7 + $0xd0] sm:$0xff]  }
  0x64   : > { %v1180_v15 = vld [vmem:[%s1546_s7 + $0x20] sm:$0xff]   ;;  %v1184_v19 = vld [vmem:[%s1546_s7 + $0x18] sm:$0xff]   ;;  %v1188_v23 = vld [vmem:[%s1546_s7 + $0x10] sm:$0xff]  }
  0x65   : > { %1008 = vmatpush3.bf16.msra.mxu0 %v1172_v7  ;;  %v1181_v16 = vld [vmem:[%s1546_s7 + $0xa0] sm:$0xff]   ;;  %v1185_v20 = vld [vmem:[%s1546_s7 + $0x98] sm:$0xff]   ;;  %v1189_v24 = vld [vmem:[%s1546_s7 + $0x90] sm:$0xff]  }
  0x66   : > { %1030 = vmatpush3.bf16.msra.mxu1 %v1173_v8  ;;  %1009 = vmatprep.subr.bf16.mxu0 %v1174_v9  ;;  %v1190_v25 = vld [vmem:[%s1546_s7 + $0x48] sm:$0xff]   ;;  %v1194_v29 = vld [vmem:[%s1546_s7 + $0x40] sm:$0xff]   ;;  %v323_v35 = vld [vmem:[%s1539_s12 + $0x18] sm:$0xff] }
  0x67   : > { %1031 = vmatprep.subr.bf16.mxu1 %v1175_v10  ;;  %v1191_v26 = vld [vmem:[%s1546_s7 + $0xc8] sm:$0xff]   ;;  %v1195_v30 = vld [vmem:[%s1546_s7 + $0xc0] sm:$0xff]   ;;  %v327_v37 = vld [vmem:[%s1539_s12 + $0x38] sm:$0xff] }
  0x68   : > { %v1192_v27 = vld [vmem:[%s1546_s7 + $0x8] sm:$0xff]   ;;  %v1196_v31 = vld [vmem:[%s1546_s7] sm:$0xff]   ;;  %v331_v40 = vpack.c.bf16 %v327_v37, %v323_v35  ;;  %v322_v42 = vld [vmem:[%s1539_s12 + $0x10] sm:$0xff] }
  0x69   : > { %1010 = vmatpush3.bf16.msra.mxu0 %v1176_v11  ;;  %v1193_v28 = vld [vmem:[%s1546_s7 + $0x88] sm:$0xff]   ;;  %v1197_v32 = vld [vmem:[%s1546_s7 + $0x80] sm:$0xff]   ;;  %v326_v43 = vld [vmem:[%s1539_s12 + $0x30] sm:$0xff] }
  0x6a   : > { %1032 = vmatpush3.bf16.msra.mxu1 %v1177_v12  ;;  %1011 = vmatprep.subr.bf16.mxu0 %v1178_v13  ;;  %v321_v33 = vld [vmem:[%s1539_s12 + $0x8] sm:$0xff]  ;;  %v320_v38 = vld [vmem:[%s1539_s12] sm:$0xff]  ;;  %v330_v44 = vpack.c.bf16 %v326_v43, %v322_v42  ;;  %v318_v52 = vld [vmem:[#allocation2] sm:$0xff] }
  0x6b   : > { %1033 = vmatprep.subr.bf16.mxu1 %v1179_v14  ;;  %v325_v34 = vld [vmem:[%s1539_s12 + $0x28] sm:$0xff]  ;;  %v324_v39 = vld [vmem:[%s1539_s12 + $0x20] sm:$0xff]  ;;  %661 = vmatprep.mubr.bf16.mxu1 %v331_v40  ;;  %v319_v60 = vld [vmem:[#allocation2 + $0x8] sm:$0xff] }
  0x6c   : > { %v329_v36 = vpack.c.bf16 %v325_v34, %v321_v33  ;;  %v328_v41 = vpack.c.bf16 %v324_v39, %v320_v38 }
  0x6d   : > { %1012 = vmatpush3.bf16.msra.mxu0 %v1180_v15 }
  0x6e   : > { %1034 = vmatpush3.bf16.msra.mxu1 %v1181_v16  ;;  %1013 = vmatprep.subr.bf16.mxu0 %v1182_v17 }
  0x6f   : > { %1035 = vmatprep.subr.bf16.mxu1 %v1183_v18  ;;  %620 = vmatprep.mubr.bf16.mxu0 %v329_v36 }
  0x71   : > { %1014 = vmatpush3.bf16.msra.mxu0 %v1184_v19 }
  0x72   : > { %1036 = vmatpush3.bf16.msra.mxu1 %v1185_v20  ;;  %1015 = vmatprep.subr.bf16.mxu0 %v1186_v21 }
  0x73   : > { %1037 = vmatprep.subr.bf16.mxu1 %v1187_v22 }
  0x75   : > { %1016 = vmatpush3.bf16.msra.mxu0 %v1188_v23 }
  0x76   : > { %1038 = vmatpush3.bf16.msra.mxu1 %v1189_v24  ;;  %1017 = vmatprep.subr.bf16.mxu0 %v1190_v25 }
  0x77   : > { %1039 = vmatprep.subr.bf16.mxu1 %v1191_v26 }
  0x79   : > { %1018 = vmatpush3.bf16.msra.mxu0 %v1192_v27 }
  0x7a   : > { %1040 = vmatpush3.bf16.msra.mxu1 %v1193_v28  ;;  %1019 = vmatprep.subr.bf16.mxu0 %v1194_v29 }
  0x7b   : > { %1041 = vmatprep.subr.bf16.mxu1 %v1195_v30 }
  0x7d   : > { %1020 = vmatpush3.bf16.msra.mxu0 %v1196_v31 }
  0x7e   : > { %1042 = vmatpush3.bf16.msra.mxu1 %v1197_v32 }
  0x80   : > { %621 = vmatmul.mubr.bf16.vlgmr.msra.gmra.mxu0 %v328_v41 }
  0x81   : > { %662 = vmatmul.mubr.bf16.vlgmr.msra.gmra.mxu1 %v330_v44 }
 0x140   : > { %v1021_v45 = vpop.f32.mrf.mxu0 }
 0x141   : > { %v1043_v46 = vpop.f32.mrf.mxu1 }
 0x142   : > { %v1022_v47 = vpop.f32.mrf.mxu0 }
 0x143   : > { %v1023_v48 = vadd.f32 %v1022_v47, %v1021_v45  ;;  %v1044_v49 = vpop.f32.mrf.mxu1 }
 0x144   : > { %v1045_v50 = vadd.f32 %v1044_v49, %v1043_v46  ;;  %v1024_v51 = vpop.f32.mrf.mxu0 }
 0x145   : > { %v1046_v53 = vpop.f32.mrf.mxu1 }
 0x146   : > { %v664_v54 = vadd.f32 %v1045_v50, %v1023_v48  ;;  %v1025_v55 = vpop.f32.mrf.mxu0 }
 0x147   : > { %v1026_v56 = vadd.f32 %v1025_v55, %v1024_v51  ;;  %v1047_v57 = vpop.f32.mrf.mxu1 }
 0x148   : > { %v670_v58 = vadd.f32 %v664_v54, %v318_v52  ;;  %v1048_v59 = vadd.f32 %v1047_v57, %v1046_v53 }
 0x14a   : > { %672 = vst [vmem:[#allocation2] sm:$0xff] %v670_v58  ;;  %v667_v61 = vadd.f32 %v1048_v59, %v1026_v56  ;;  %677 = sbr.rel (%p979_p3) target bundleno = 728 (0x2d8), region = 60 }
 0x14c   : > { %v671_v62 = vadd.f32 %v667_v61, %v319_v60 }
 0x14e   : > { %673 = vst [vmem:[#allocation2 + $0x8] sm:$0xff] %v671_v62 }
 0x14f   : > { %v1198_v63 = vld [vmem:[#allocation8 + $0x38] sm:$0xff]   ;;  %v1389_v0 = vmov 0.0   ;;  %v1199_v1 = vld [vmem:[#allocation8 + $0x30] sm:$0xff]   ;;  %vm1390_vm0 = vmmov 0   ;;  %v1200_v2 = vld [vmem:[#allocation8 + $0x28] sm:$0xff]  }
 0x150   : > { %1058 = vmatprep.subr.bf16.mxu0 %v1389_v0  ;;  %1074 = vmatprep.mubr.msk.bf16.mxu0 %vm1390_vm0, %v1389_v0  ;;  %v1201_v3 = vld [vmem:[#allocation8 + $0x20] sm:$0xff]   ;;  %v1202_v4 = vld [vmem:[#allocation8 + $0x18] sm:$0xff]   ;;  %v1203_v5 = vld [vmem:[#allocation8 + $0x10] sm:$0xff]  }
 0x151   : > { %1059 = vmatpush3.bf16.msra.mxu0 %v1198_v63  ;;  %v1204_v6 = vld [vmem:[#allocation8 + $0x8] sm:$0xff]   ;;  %v678_v7 = vld [vmem:[#allocation2] sm:$0xff]  ;;  %v1205_v12 = vld [vmem:[#allocation8] sm:$0xff]  }
 0x152   : > { %1060 = vmatprep.subr.bf16.mxu0 %v1389_v0  ;;  %v980_v9 = vld [vmem:[%s1636_s2] ss:$0 sm:$0xff] }
 0x153   : > { %v687_v10 = vadd.f32 %v980_v9, %v678_v7  ;;  %v981_v14 = vld [vmem:[%s1638_s4] ss:$0 sm:$0xff] }
 0x155   : > { %1061 = vmatpush3.bf16.msra.mxu0 %v1199_v1  ;;  %v679_v8 = vld [vmem:[#allocation2 + $0x8] sm:$0xff] }
 0x156   : > { %1062 = vmatprep.subr.bf16.mxu0 %v1389_v0  ;;  %v688_v11 = vadd.f32 %v980_v9, %v679_v8 }
 0x158   : > { %v689_v13 = vpack.c.bf16 %v688_v11, %v687_v10 }
 0x159   : > { %1063 = vmatpush3.bf16.msra.mxu0 %v1200_v2 }
 0x15a   : > { %1064 = vmatprep.subr.bf16.mxu0 %v1389_v0 }
 0x15d   : > { %1065 = vmatpush3.bf16.msra.mxu0 %v1201_v3 }
 0x15e   : > { %1066 = vmatprep.subr.bf16.mxu0 %v1389_v0 }
 0x161   : > { %1067 = vmatpush3.bf16.msra.mxu0 %v1202_v4 }
 0x162   : > { %1068 = vmatprep.subr.bf16.mxu0 %v1389_v0 }
 0x165   : > { %1069 = vmatpush3.bf16.msra.mxu0 %v1203_v5 }
 0x166   : > { %1070 = vmatprep.subr.bf16.mxu0 %v1389_v0 }
 0x169   : > { %1071 = vmatpush3.bf16.msra.mxu0 %v1204_v6 }
 0x16a   : > { %1072 = vmatprep.subr.bf16.mxu0 %v1389_v0 }
 0x16d   : > { %1073 = vmatpush3.bf16.msra.mxu0 %v1205_v12 }
 0x170   : > { %1075 = vmatmul.mubr.bf16.vlgmr.msra.gmra.mxu0 %v689_v13 }
 0x230   : > { %v795_v15 = vpop.f32.mrf.mxu0 }
 0x231   : > { %v796_v16 = vadd.f32 %v981_v14, %v795_v15 }
 0x232   : > { %v1076_v17 = vpop.f32.mrf.mxu0 }
 0x233   : > { %v802_v18 = vmul.f32 %v796_v16, %v796_v16 }
 0x234   : > { %v798_v19 = vpop.f32.mrf.mxu0 }
 0x235   : > { %v799_v20 = vadd.f32 %v981_v14, %v798_v19  ;;  %804 = vadd.xlane.f32.xlu0 %v802_v18 }
 0x236   : > { %v1077_v21 = vpop.f32.mrf.mxu0 }
 0x237   : > { %v803_v22 = vmul.f32 %v799_v20, %v799_v20 }
 0x239   : > { %806 = vadd.xlane.f32.xlu0 %v803_v22 }
 0x2be   : > { %v805_v23 = vpop.xlane.xlu0 %804 }
 0x2bf   : > { %v808_v24 = vmax.f32 %v805_v23, 1e-24 }
 0x2c1   : > { %1206 = vrsqrt.f32 %v808_v24 }
 0x2c2   : > { %v807_v25 = vpop.xlane.xlu0 %806 }
 0x2c3   : > { %v809_v26 = vmax.f32 %v807_v25, 1e-24 }
 0x2c5   : > { %1208 = vrsqrt.f32 %v809_v26 }
 0x2ce   : > { %v1207_v27 = vpop.eup %1206 }
 0x2cf   : > { %v812_v29 = vmul.f32 %v1207_v27, %v796_v16 }
 0x2d2   : > { %v1209_v28 = vpop.eup %1208 }
 0x2d3   : > { %v813_v30 = vmul.f32 %v1209_v28, %v799_v20 }
 0x2d5   : > { %v1003_v31 = vpack.c.bf16 %v813_v30, %v812_v29 }
 0x2d7   : > { %1004 = vst [vmem:[#allocation9] sm:$0xff] %v1003_v31  }
 0x2d8 PF: > { %p1104_p0 = scmp.eq.s32.totalorder %s1453_s24, 1  ;;  %s1391_s15 = smov [#allocation9]  }
 0x2d9   : > { %s833_s17 = sshll.u32 %s1391_s15, 4  ;;  %s834_s17 = int_to_ptr.vmem [resolvable:$true] %s833_s17 }
 0x2da   : > { %s1292_s18 = scalar_lea.vmem %s834_s17, 128  ;;  %p1299_p7 = scmp.lt.s32.totalorder %s834_s17, %s834_s17 }
 0x2db   : > { %p1293_p1 = scmp.ne.s32.totalorder %s834_s17, %s1292_s18  ;;  %p1300_p4 = scmp.lt.s32.totalorder %s1292_s18, %s1292_s18 }
 0x2dd   : > { %p1294_p2 = pnand %p1293_p1, %p1104_p0  ;;  %p1301_p6 = por %p1300_p4, %p1299_p7 }
 0x2df   : > { %p1295_p5 = pneg %p1294_p2 }
 0x2e1   : > { %p1302_p9 = pnand %p1301_p6, %p1295_p5 }
 0x2e3   : > { %1305 = shalt.err (!%p1302_p9)
}
 0x2e4   : > { %s1392_s30 = smov 64   ;;  %s1393_s16 = smov 4  }
 0x2e5   : > { %1087 = dma.vmem_to_hbm [thread:$0]  (%p1104_p0), %s834_s17, 128, %s1639_s5, [#allocation5], %s1392_s30, %s1392_s30, %s1393_s16  }
 0x2e6   : > { %1353 = dma.done.wait (%p1104_p0), [#allocation5], 128  }
 0x2e7   : > { %1355 = vsyncadd (%p1104_p0), [#allocation5], 4294967168 }
 0x2e8 PF: > { %s22_s23 = sadd.s32 1, %s1378_s23   ;;  %s1661_s14 = sld [smem:[#allocation14_spill]] }
 0x2e9   : > { %p19_p10 = scmp.ge.s32.totalorder %s22_s23, 4   ;;  %s1662_s20 = sld [smem:[#allocation16_spill]] }
 0x2ea   : > { %s1663_s28 = sld [smem:[#allocation15_spill]]  ;;  %s1664_s18 = smov %s1362_s19 }
 0x2eb   : > { %s1666_s21 = smov %s1374_s22 }
 0x2ec   :  { %21 = sbr.rel (!%p19_p10) target bundleno = 10 (0xa), region = 103 }
 0x2ee   : > { %s1665_s19 = smov %s1661_s14 }
 0x2f0   : > { %s1667_s22 = smov %s1663_s28 }
 0x2f1   :  { %849 = vsyncpa [#allocation4], 1 }
 0x2f2   :  { %851 = vsyncpa [#allocation4 + $0x1], 1 }
 0x2f3   :  { %852 = vsyncpa [#allocation7], 1 }
 0x2f4   :  { %854 = vsyncpa [#allocation7 + $0x1], 1 }
 0x2f5   :  { %855 = vsyncpa [#allocation5], 1 }
 0x2f6   :  { %857 = vsyncpa [#allocation5 + $0x1], 1 }

</bundles_post_ra>
